<compile_context>
chip_gen: v5e
topology: v5e:2x2
jax: 0.10.0
libtpu: 0.0.40
codegen_flags: <defaults>
</compile_context>

<pallas_src>
import functools
import math

import jax
import jax.numpy as jnp
from jax.experimental import pallas as pl
from jax.experimental.pallas import tpu as pltpu


_INV_SQRT2 = 1.0 / math.sqrt(2.0)
_MiB = 1024 * 1024


def _vmem_capacity_bytes() -> int:
    try:
        return int(pltpu.get_tpu_info().vmem_capacity_bytes)
    except Exception:
        return 64 * _MiB  # conservative: v7x per-TensorCore VMEM


_VMEM_PHYSICAL = _vmem_capacity_bytes()
# Leave headroom for compiler-internal scratch / semaphores / pipeline slop.
_VMEM_BUDGET = max(16 * _MiB, _VMEM_PHYSICAL - 16 * _MiB)


def _gelu_exact_f32(h):
    # Exact (erf-based) GELU to match nn.GELU() default semantics.
    # (tanh-approx GELU would ride the EUP slot and can be faster, but changes numerics.)
    return 0.5 * h * (1.0 + jax.lax.erf(h * _INV_SQRT2))


def _ffn_resident_kernel(x_ref, w1_ref, b1_ref, w2_ref, b2_ref, o_ref):
    # x_ref: (TILE_N, d_model_p)   w1_ref: (d_model_p, d_ff_p)   b1_ref: (1, d_ff_p)
    # w2_ref: (d_ff_p, d_model_p)  b2_ref: (1, d_model_p)        o_ref: (TILE_N, d_model_p)
    h = jnp.dot(x_ref[...], w1_ref[...], preferred_element_type=jnp.float32)
    h = h + b1_ref[...].astype(jnp.float32)
    h = _gelu_exact_f32(h)
    # TODO(synk): Dropout(p=0.1) is eval-mode identity here; training mode would need
    #             pltpu.prng_seed/prng_random_bits masking seeded per grid step.
    out = jnp.dot(h.astype(w2_ref.dtype), w2_ref[...], preferred_element_type=jnp.float32)
    o_ref[...] = (out + b2_ref[...].astype(jnp.float32)).astype(o_ref.dtype)


def _ffn_streaming_kernel(x_ref, w1_ref, b1_ref, w2_ref, b2_ref, o_ref, acc_ref):
    # x_ref: (TILE_N, d_model_p)   w1_ref: (d_model_p, TILE_F)   b1_ref: (1, TILE_F)
    # w2_ref: (TILE_F, d_model_p)  b2_ref: (1, d_model_p)
    # o_ref: (TILE_N, d_model_p)   acc_ref: (TILE_N, d_model_p) f32 scratch
    f = pl.program_id(1)

    @pl.when(f == 0)
    def _():
        acc_ref[...] = jnp.zeros_like(acc_ref)

    h = jnp.dot(x_ref[...], w1_ref[...], preferred_element_type=jnp.float32)
    h = h + b1_ref[...].astype(jnp.float32)
    h = _gelu_exact_f32(h)
    # Dropout: eval-mode identity (see TODO above).
    acc_ref[...] += jnp.dot(h.astype(w2_ref.dtype), w2_ref[...],
                            preferred_element_type=jnp.float32)

    @pl.when(f == pl.num_programs(1) - 1)
    def _():
        o_ref[...] = (acc_ref[...] + b2_ref[...].astype(jnp.float32)).astype(o_ref.dtype)


def _round_up(v: int, m: int) -> int:
    return (v + m - 1) // m * m


@functools.partial(jax.jit, static_argnames=("tile_n", "tile_f", "compute_dtype"))
def feed_forward(x, w1, b1, w2, b2, *, tile_n=512, tile_f=512, compute_dtype=jnp.bfloat16):
    """x: [B, T, d_model]; w1: [d_model, d_ff]; w2: [d_ff, d_model]. Returns [B, T, d_model]."""
    B, T, d_model = x.shape
    d_ff = w1.shape[1]
    N = B * T
    out_dtype = x.dtype
    c_sz = jnp.dtype(compute_dtype).itemsize
    o_sz = jnp.dtype(out_dtype).itemsize

    d_model_p = _round_up(d_model, 128)   # lane axis of x / out / w2 cols
    d_ff_p = _round_up(d_ff, 128)         # lane axis of w1 cols / b1

    # ---- token tile: sublane aligned; guarantee >= 2 tiles for megacore when N allows ----
    tile_n = max(8, min(tile_n, _round_up(N, 8)))
    if N > 8 and _round_up(N, tile_n) // tile_n < 2:
        tile_n = _round_up((N + 1) // 2, 8)

    # ---- path selection: resident weights (preferred) vs d_ff streaming -------------------
    def _resident_bytes(tn):
        return (2 * tn * d_model_p * c_sz            # x tile (double-buffered)
                + 2 * d_model_p * d_ff_p * c_sz      # w1 (pipeline allocates 2 bufs)
                + 2 * d_ff_p * d_model_p * c_sz      # w2
                + 2 * (d_ff_p + d_model_p) * 4       # biases (f32, tiny)
                + tn * d_ff_p * (4 + c_sz)           # hidden f32 + bf16 copy
                + 2 * tn * d_model_p * o_sz)         # out tile (double-buffered)

    min_resident_tile_n = min(tile_n, 256)
    rtile = tile_n
    while rtile > min_resident_tile_n and _resident_bytes(rtile) > _VMEM_BUDGET:
        rtile = max(min_resident_tile_n, _round_up(rtile // 2, 8))
    use_resident = _resident_bytes(rtile) <= _VMEM_BUDGET

    if use_resident:
        tile_n = rtile
        d_ff_pad = d_ff_p
        vmem_needed = _resident_bytes(tile_n)
    else:
        tile_f = min(tile_f, d_ff_p)

        def _streaming_bytes(tn, tf):
            return (2 * tn * d_model_p * c_sz
                    + 2 * d_model_p * tf * c_sz
                    + 2 * tf * d_model_p * c_sz
                    + 2 * (tf + d_model_p) * 4
                    + tn * tf * (4 + c_sz)
                    + tn * d_model_p * 4             # f32 accumulator scratch
                    + 2 * tn * d_model_p * o_sz)

        while tile_f > 128 and _streaming_bytes(tile_n, tile_f) > _VMEM_BUDGET:
            tile_f //= 2
        while tile_n > 8 and _streaming_bytes(tile_n, tile_f) > _VMEM_BUDGET:
            tile_n = max(8, _round_up(tile_n // 2, 8))
        d_ff_pad = _round_up(d_ff_p, tile_f)
        vmem_needed = _streaming_bytes(tile_n, tile_f)

    n_p = _round_up(N, tile_n)
    n_tiles = n_p // tile_n

    # ---- pad / cast only when needed -------------------------------------------------------
    x2d = x.reshape(N, d_model)
    if n_p != N or d_model_p != d_model:
        x2d = jnp.pad(x2d, ((0, n_p - N), (0, d_model_p - d_model)))
    x2d = x2d.astype(compute_dtype)

    w1p = w1.astype(compute_dtype)
    if (d_model_p, d_ff_pad) != (d_model, d_ff):
        w1p = jnp.pad(w1p, ((0, d_model_p - d_model), (0, d_ff_pad - d_ff)))
    w2p = w2.astype(compute_dtype)
    if (d_ff_pad, d_model_p) != (d_ff, d_model):
        w2p = jnp.pad(w2p, ((0, d_ff_pad - d_ff), (0, d_model_p - d_model)))

    b1p = b1.astype(jnp.float32).reshape(1, d_ff)
    if d_ff_pad != d_ff:
        b1p = jnp.pad(b1p, ((0, 0), (0, d_ff_pad - d_ff)))
    b2p = b2.astype(jnp.float32).reshape(1, d_model)
    if d_model_p != d_model:
        b2p = jnp.pad(b2p, ((0, 0), (0, d_model_p - d_model)))

    # ---- cost estimate reflecting real weight traffic for the chosen schedule --------------
    weight_bytes = 2 * d_model_p * d_ff_pad * c_sz
    weight_passes = 1 if use_resident else n_tiles
    cost = pl.CostEstimate(
        flops=4 * n_p * d_model_p * d_ff_pad,
        transcendentals=n_p * d_ff_pad,
        bytes_accessed=(n_p * d_model_p * (c_sz + o_sz)
                        + weight_bytes * weight_passes
                        + (d_ff_pad + d_model_p) * 4),
    )

    vmem_limit = int(min(_VMEM_PHYSICAL - 4 * _MiB,
                         max(vmem_needed + 8 * _MiB, 32 * _MiB)))

    if use_resident:
        grid_spec = pltpu.PrefetchScalarGridSpec(
            num_scalar_prefetch=0,
            grid=(n_tiles,),
            in_specs=[
                # x tile streams along the token axis.
                pl.BlockSpec((tile_n, d_model_p), lambda i: (i, 0)),
                # Full-array, constant-index weight/bias blocks -> DMA'd once for the whole kernel.
                pl.BlockSpec((d_model_p, d_ff_pad), lambda i: (0, 0)),
                pl.BlockSpec((1, d_ff_pad), lambda i: (0, 0)),
                pl.BlockSpec((d_ff_pad, d_model_p), lambda i: (0, 0)),
                pl.BlockSpec((1, d_model_p), lambda i: (0, 0)),
            ],
            out_specs=pl.BlockSpec((tile_n, d_model_p), lambda i: (i, 0)),
        )
        kernel = _ffn_resident_kernel
        dim_sem = ("parallel",)
    else:
        grid_spec = pltpu.PrefetchScalarGridSpec(
            num_scalar_prefetch=0,
            grid=(n_tiles, d_ff_pad // tile_f),
            in_specs=[
                pl.BlockSpec((tile_n, d_model_p), lambda i, f: (i, 0)),
                pl.BlockSpec((d_model_p, tile_f), lambda i, f: (0, f)),
                pl.BlockSpec((1, tile_f), lambda i, f: (0, f)),
                pl.BlockSpec((tile_f, d_model_p), lambda i, f: (f, 0)),
                pl.BlockSpec((1, d_model_p), lambda i, f: (0, 0)),
            ],
            # Same output block across the d_ff (reduction) axis -> resident accumulator target.
            out_specs=pl.BlockSpec((tile_n, d_model_p), lambda i, f: (i, 0)),
            scratch_shapes=[pltpu.VMEM((tile_n, d_model_p), jnp.float32)],
        )
        kernel = _ffn_streaming_kernel
        dim_sem = ("parallel", "arbitrary")

    out = pl.pallas_call(
        kernel,
        out_shape=jax.ShapeDtypeStruct((n_p, d_model_p), out_dtype),
        grid_spec=grid_spec,
        compiler_params=pltpu.CompilerParams(
            dimension_semantics=dim_sem,
            vmem_limit_bytes=vmem_limit,
        ),
        cost_estimate=cost,
    )(x2d, w1p, b1p, w2p, b2p)

    if n_p != N or d_model_p != d_model:
        out = out[:N, :d_model]
    return out.reshape(B, T, d_model)


def init_params(key, d_model, d_ff, dtype=jnp.float32):
    """Deterministic init mimicking nn.Linear default (uniform +/- 1/sqrt(fan_in))."""
    k1, k2, k3, k4 = jax.random.split(key, 4)
    bound1 = 1.0 / math.sqrt(d_model)
    bound2 = 1.0 / math.sqrt(d_ff)
    # stored as [in, out] so the kernel does x @ W directly
    w1 = jax.random.uniform(k1, (d_model, d_ff), dtype, -bound1, bound1)
    b1 = jax.random.uniform(k2, (d_ff,), dtype, -bound1, bound1)
    w2 = jax.random.uniform(k3, (d_ff, d_model), dtype, -bound2, bound2)
    b2 = jax.random.uniform(k4, (d_model,), dtype, -bound2, bound2)
    return w1, b1, w2, b2


if __name__ == "__main__":
    key = jax.random.PRNGKey(0)
    kx, kp = jax.random.split(key)

    B, T, d_model, d_ff = 2, 8, 32, 128
    x = jax.random.normal(kx, (B, T, d_model), jnp.float32)
    w1, b1, w2, b2 = init_params(kp, d_model, d_ff)

    y = feed_forward(x, w1, b1, w2, b2)
    y = jax.block_until_ready(y)

    # Reference with the same MXU dtype policy (bf16 matmuls, f32 accumulation / bias / GELU).
    xb = x.reshape(-1, d_model).astype(jnp.bfloat16)
    h_ref = jnp.dot(xb, w1.astype(jnp.bfloat16), preferred_element_type=jnp.float32) + b1
    h_ref = 0.5 * h_ref * (1.0 + jax.lax.erf(h_ref / math.sqrt(2.0)))
    y_ref = jnp.dot(h_ref.astype(jnp.bfloat16), w2.astype(jnp.bfloat16),
                    preferred_element_type=jnp.float32) + b2
    y_ref = y_ref.reshape(B, T, d_model).astype(x.dtype)

    assert jnp.allclose(y, y_ref, atol=2e-2, rtol=2e-2), "mismatch vs reference"
    print("KERNEL_OK")
</pallas_src>

<mosaic_0001>
module attributes {stable_mosaic.version = 11 : i64} {
  func.func @_ffn_resident_kernel(%arg0: i32, %arg1: memref<8x128xbf16, #tpu.memory_space<vmem>>, %arg2: memref<128x128xbf16, #tpu.memory_space<vmem>>, %arg3: memref<1x128xf32, #tpu.memory_space<vmem>>, %arg4: memref<128x128xbf16, #tpu.memory_space<vmem>>, %arg5: memref<1x128xf32, #tpu.memory_space<vmem>>, %arg6: memref<8x128xf32, #tpu.memory_space<vmem>>) attributes {dimension_semantics = [#tpu.dimension_semantics<parallel>], iteration_bounds = array<i64: 2>, scalar_prefetch = 0 : i64, scratch_operands = 0 : i64, tpu.core_type = #tpu.core_type<tc>, window_params = [{transform_indices = @transform_0, window_bounds = array<i64: 8, 128>}, {pipeline_mode = #tpu.pipeline_mode<synchronous>, transform_indices = @transform_1, window_bounds = array<i64: 128, 128>}, {pipeline_mode = #tpu.pipeline_mode<synchronous>, transform_indices = @transform_2, window_bounds = array<i64: 1, 128>}, {pipeline_mode = #tpu.pipeline_mode<synchronous>, transform_indices = @transform_3, window_bounds = array<i64: 128, 128>}, {pipeline_mode = #tpu.pipeline_mode<synchronous>, transform_indices = @transform_4, window_bounds = array<i64: 1, 128>}, {transform_indices = @transform_5, window_bounds = array<i64: 8, 128>}]} {
    %c0 = arith.constant 0 : index
    %c0_0 = arith.constant 0 : index
    %0 = vector.load %arg1[%c0, %c0_0] : memref<8x128xbf16, #tpu.memory_space<vmem>>, vector<8x128xbf16>
    %c0_1 = arith.constant 0 : index
    %c0_2 = arith.constant 0 : index
    %1 = vector.load %arg2[%c0_1, %c0_2] : memref<128x128xbf16, #tpu.memory_space<vmem>>, vector<128x128xbf16>
    %cst = arith.constant dense<0.000000e+00> : vector<8x128xf32>
    %2 = tpu.matmul %0, %1, %cst {dimension_numbers = #tpu.dot_dimension_numbers<[1], [0], [0], [1], [0, 0, 1, 1], [], []>} : vector<8x128xbf16>, vector<128x128xbf16>, vector<8x128xf32> -> vector<8x128xf32>
    %c0_3 = arith.constant 0 : index
    %c0_4 = arith.constant 0 : index
    %3 = vector.load %arg3[%c0_3, %c0_4] : memref<1x128xf32, #tpu.memory_space<vmem>>, vector<1x128xf32>
    %4 = vector.broadcast %3 : vector<1x128xf32> to vector<8x128xf32>
    %5 = arith.addf %2, %4 : vector<8x128xf32>
    %cst_5 = arith.constant 5.000000e-01 : f32
    %6 = vector.broadcast %cst_5 : f32 to vector<8x128xf32>
    %7 = arith.mulf %6, %5 : vector<8x128xf32>
    %cst_6 = arith.constant 0.707106769 : f32
    %8 = vector.broadcast %cst_6 : f32 to vector<8x128xf32>
    %9 = arith.mulf %5, %8 : vector<8x128xf32>
    %10 = math.erf %9 : vector<8x128xf32>
    %cst_7 = arith.constant 1.000000e+00 : f32
    %11 = vector.broadcast %cst_7 : f32 to vector<8x128xf32>
    %12 = arith.addf %11, %10 : vector<8x128xf32>
    %13 = arith.mulf %7, %12 : vector<8x128xf32>
    %14 = arith.truncf %13 : vector<8x128xf32> to vector<8x128xbf16>
    %c0_8 = arith.constant 0 : index
    %c0_9 = arith.constant 0 : index
    %15 = vector.load %arg4[%c0_8, %c0_9] : memref<128x128xbf16, #tpu.memory_space<vmem>>, vector<128x128xbf16>
    %cst_10 = arith.constant dense<0.000000e+00> : vector<8x128xf32>
    %16 = tpu.matmul %14, %15, %cst_10 {dimension_numbers = #tpu.dot_dimension_numbers<[1], [0], [0], [1], [0, 0, 1, 1], [], []>} : vector<8x128xbf16>, vector<128x128xbf16>, vector<8x128xf32> -> vector<8x128xf32>
    %c0_11 = arith.constant 0 : index
    %c0_12 = arith.constant 0 : index
    %17 = vector.load %arg5[%c0_11, %c0_12] : memref<1x128xf32, #tpu.memory_space<vmem>>, vector<1x128xf32>
    %18 = vector.broadcast %17 : vector<1x128xf32> to vector<8x128xf32>
    %19 = arith.addf %16, %18 : vector<8x128xf32>
    %c0_13 = arith.constant 0 : index
    %c0_14 = arith.constant 0 : index
    %20 = vector.load %arg6[%c0_13, %c0_14] : memref<8x128xf32, #tpu.memory_space<vmem>>, vector<8x128xf32>
    tpu.vector_store %arg6[%c0_13, %c0_14], %19 {strides = array<i32>} : memref<8x128xf32, #tpu.memory_space<vmem>>, vector<8x128xf32>,
    return
  }
  func.func @transform_0(%arg0: i32) -> (i32, i32) {
    %c0_i32 = arith.constant 0 : i32
    %c0_i32_0 = arith.constant 0 : i32
    return %arg0, %c0_i32 : i32, i32
  }
  func.func @transform_1(%arg0: i32) -> (i32, i32) {
    %c0_i32 = arith.constant 0 : i32
    %c0_i32_0 = arith.constant 0 : i32
    %c0_i32_1 = arith.constant 0 : i32
    return %c0_i32, %c0_i32_0 : i32, i32
  }
  func.func @transform_2(%arg0: i32) -> (i32, i32) {
    %c0_i32 = arith.constant 0 : i32
    %c0_i32_0 = arith.constant 0 : i32
    %c0_i32_1 = arith.constant 0 : i32
    return %c0_i32, %c0_i32_0 : i32, i32
  }
  func.func @transform_3(%arg0: i32) -> (i32, i32) {
    %c0_i32 = arith.constant 0 : i32
    %c0_i32_0 = arith.constant 0 : i32
    %c0_i32_1 = arith.constant 0 : i32
    return %c0_i32, %c0_i32_0 : i32, i32
  }
  func.func @transform_4(%arg0: i32) -> (i32, i32) {
    %c0_i32 = arith.constant 0 : i32
    %c0_i32_0 = arith.constant 0 : i32
    %c0_i32_1 = arith.constant 0 : i32
    return %c0_i32, %c0_i32_0 : i32, i32
  }
  func.func @transform_5(%arg0: i32) -> (i32, i32) {
    %c0_i32 = arith.constant 0 : i32
    %c0_i32_0 = arith.constant 0 : i32
    return %arg0, %c0_i32 : i32, i32
  }
}

</mosaic_0001>

<bundles_post_ra>
// kernel: feed_forward.1
= control target key start
LH: loop header
LB: loop body
LE: loop exit
PB: predicated region body
PF: predicated region fallthrough
CT: control target
= control target key end

     0   :  { %s622_s18 = smov 0   ;;  %s697_s0 = inlined_call_operand.vmem [shape: bf16[16,128], index: 0, kind: input, shape index: {}]   ;;  %s698_s1 = inlined_call_operand.vmem [shape: bf16[128,128], index: 1, kind: input, shape index: {}]   ;;  %s699_s2 = inlined_call_operand.vmem [shape: f32[1,128], index: 2, kind: input, shape index: {}]   ;;  %s700_s3 = inlined_call_operand.vmem [shape: bf16[128,128], index: 3, kind: input, shape index: {}]   ;;  %s701_s4 = inlined_call_operand.vmem [shape: f32[1,128], index: 4, kind: input, shape index: {}]   ;;  %s702_s5 = inlined_call_operand.vmem [shape: f32[16,128], index: 5, kind: output, shape index: {}]  }
   0x1 LB: > { %s482_s19 = sadd.s32 4294967295, %s590_s18   ;;  %p486_p0 = scmp.ge.s32.totalorder %s590_s18, 1  ;;  %s590_s18 = sphi %s622_s18, %s15_s18  }
   0x2   : > { %p186_p1 = scmp.lt.s32.totalorder %s590_s18, 3 }
   0x4   : > { %p187_p2 = pnand %p486_p0, %p186_p1 }
   0x5   : > { %p212_p3 = scmp.lt.s32.totalorder (!%p187_p2), %s482_s19, 1 }
   0x6   : > { %190 = sbr.rel (%p187_p2) target bundleno = 358 (0x166), region = 40 }
   0xb   : > { %v563_v0 = vld [vmem:[%s698_s1 + $0x38] sm:$0xff]  ;;  %v562_v1 = vld [vmem:[%s698_s1 + $0x30] sm:$0xff]  ;;  %v561_v2 = vld [vmem:[%s698_s1 + $0x28] sm:$0xff]  ;;  %s704_s19 = smov (!%p212_p3, %s482_s19), 1 }
   0xc   : > { %289 = vmatpush.bf16.msra.mxu0 %v563_v0  ;;  %v560_v3 = vld [vmem:[%s698_s1 + $0x20] sm:$0xff]  ;;  %v559_v4 = vld [vmem:[%s698_s1 + $0x18] sm:$0xff]  ;;  %v558_v5 = vld [vmem:[%s698_s1 + $0x10] sm:$0xff]  ;;  %s487_s9 = sshll.u32 %s704_s19, 2  ;;  %s488_s10 = sshll.u32 %s704_s19, 3 }
   0xd   : > { %v557_v6 = vld [vmem:[%s698_s1 + $0x8] sm:$0xff]  ;;  %v556_v7 = vld [vmem:[%s698_s1] sm:$0xff]  ;;  %s215_s14 = scalar_lea.vmem %s697_s0, %s487_s9  ;;  %v571_v9 = vld [vmem:[%s700_s3 + $0x38] sm:$0xff]  ;;  %s219_s15 = scalar_lea.vmem %s702_s5, %s488_s10 }
   0xe   : > { %v220_v8 = vld [vmem:[%s215_s14] sm:$0xf]  ;;  %415 = vmatpush.bf16.msra.mxu1 %v571_v9  ;;  %v570_v10 = vld [vmem:[%s700_s3 + $0x30] sm:$0xff]  ;;  %v569_v12 = vld [vmem:[%s700_s3 + $0x28] sm:$0xff] }
   0xf   : > { %v580_v11 = vld [vmem:[%s699_s2] ss:$0 sm:$0xff]  ;;  %v567_v18 = vld [vmem:[%s700_s3 + $0x18] sm:$0xff]  ;;  %v566_v22 = vld [vmem:[%s700_s3 + $0x10] sm:$0xff] }
  0x10   : > { %290 = vmatpush.bf16.msra.mxu0 %v562_v1  ;;  %v568_v15 = vld [vmem:[%s700_s3 + $0x20] sm:$0xff]  ;;  %v565_v27 = vld [vmem:[%s700_s3 + $0x8] sm:$0xff] }
  0x11   : > { %v564_v31 = vld [vmem:[%s700_s3] sm:$0xff] }
  0x12   : > { %416 = vmatpush.bf16.msra.mxu1 %v570_v10  ;;  %v581_v61 = vld [vmem:[%s701_s4] ss:$0 sm:$0xff] }
  0x14   : > { %291 = vmatpush.bf16.msra.mxu0 %v561_v2 }
  0x16   : > { %417 = vmatpush.bf16.msra.mxu1 %v569_v12 }
  0x18   : > { %292 = vmatpush.bf16.msra.mxu0 %v560_v3 }
  0x1a   : > { %418 = vmatpush.bf16.msra.mxu1 %v568_v15 }
  0x1c   : > { %293 = vmatpush.bf16.msra.mxu0 %v559_v4 }
  0x1e   : > { %419 = vmatpush.bf16.msra.mxu1 %v567_v18 }
  0x20   : > { %294 = vmatpush.bf16.msra.mxu0 %v558_v5 }
  0x22   : > { %420 = vmatpush.bf16.msra.mxu1 %v566_v22 }
  0x24   : > { %295 = vmatpush.bf16.msra.mxu0 %v557_v6 }
  0x26   : > { %421 = vmatpush.bf16.msra.mxu1 %v565_v27 }
  0x28   : > { %296 = vmatpush.bf16.msra.mxu0 %v556_v7 }
  0x2a   : > { %422 = vmatpush.bf16.msra.mxu1 %v564_v31 }
  0x2b   : > { %297 = vmatmul.bf16.vlgmr.msra.gmra.mxu0 %v220_v8 }
  0xa8   : > { %v298_v13 = vpop.f32.mrf.mxu0 }
  0xa9   : > { %v299_v14 = vadd.f32 %v580_v11, %v298_v13 }
  0xab   : > { %v303_v16 = vmul.f32 0.70710677, %v299_v14  ;;  %v302_v57 = vmul.f32 0.5, %v299_v14 }
  0xad   : > { %v304_v17 = vmul.f32 %v303_v16, %v303_v16 }
  0xaf   : > { %v305_v19 = vmin.f32 %v304_v17, 16.0 }
  0xb0   : > { %v300_v20 = vpop.f32.mrf.mxu0 }
  0xb1   : > { %v306_v21 = vmul.f32 2.1237322e-06, %v305_v19  ;;  %v317_v23 = vmul.f32 3.8918573e-05, %v305_v19 }
  0xb3   : > { %v307_v24 = vadd.f32 0.00028619796, %v306_v21  ;;  %v318_v25 = vadd.f32 0.001143296, %v317_v23 }
  0xb5   : > { %v308_v26 = vmul.f32 %v307_v24, %v305_v19  ;;  %v319_v28 = vmul.f32 %v318_v25, %v305_v19 }
  0xb7   : > { %v320_v29 = vadd.f32 0.014752088, %v319_v28  ;;  %v309_v30 = vadd.f32 0.0036580483, %v308_v26 }
  0xb9   : > { %v321_v32 = vmul.f32 %v320_v29, %v305_v19  ;;  %v310_v34 = vmul.f32 %v309_v30, %v305_v19 }
  0xbb   : > { %v322_v33 = vadd.f32 0.112945676, %v321_v32  ;;  %v311_v37 = vadd.f32 0.05243302, %v310_v34 }
  0xbd   : > { %v323_v35 = vmul.f32 %v322_v33, %v305_v19  ;;  %v312_v40 = vmul.f32 %v311_v37, %v305_v19 }
  0xbf   : > { %v324_v36 = vadd.f32 0.4994258, %v323_v35  ;;  %v313_v41 = vadd.f32 0.18741608, %v312_v40 }
  0xc1   : > { %v325_v38 = vmul.f32 %v324_v36, %v305_v19  ;;  %v314_v43 = vmul.f32 %v313_v41, %v305_v19 }
  0xc3   : > { %v326_v39 = vadd.f32 1.0, %v325_v38  ;;  %v315_v47 = vadd.f32 1.1283791, %v314_v43 }
  0xc5   : > { %582 = vrcp.f32 %v326_v39  ;;  %v338_v46 = vand.u32 2147483648, %v326_v39  ;;  %v336_v49 = vand.u32 2147483647, %v326_v39  ;;  %vm332_vm1 = vweird.f32 %v326_v39 }
  0xc6   : > { %v316_v52 = vmul.f32 %v315_v47, %v303_v16 }
  0xc7   : > { %v339_v51 = vor.u32 1.1754944e-38, %v338_v46  ;;  %vm337_vm3 = vcmp.eq.f32.partialorder %v336_v49, 8.507059e+37 }
  0xcb   : > { %v583_v42 = vpop.eup %582 }
  0xcc   : > { %v328_v44 = vmul.f32 %v583_v42, %v326_v39  ;;  %vm333_vm0 = vweird.f32 %v583_v42 }
  0xcd   : > { %vm334_vm2 = vmor %vm332_vm1, %vm333_vm0 }
  0xce   : > { %v329_v45 = vsub.f32 1.0, %v328_v44 }
  0xd0   : > { %v330_v48 = vmul.f32 %v583_v42, %v329_v45 }
  0xd2   : > { %v331_v50 = vadd.f32 %v583_v42, %v330_v48 }
  0xd4   : > { %v335_v53 = vsel %vm334_vm2, %v583_v42, %v331_v50 }
  0xd5   : > { %v340_v54 = vsel %vm337_vm3, %v339_v51, %v335_v53 }
  0xd6   : > { %v341_v55 = vmul.f32 %v340_v54, %v316_v52 }
  0xd8   : > { %v521_v56 = vclamps-f32 %v341_v55, 1.0 }
  0xda   : > { %v344_v58 = vadd.f32 1.0, %v521_v56 }
  0xdc   : > { %v345_v59 = vmul.f32 %v344_v58, %v302_v57 }
  0xde   : > { %v346_v60 = vpack.c.bf16 %v345_v59, %v345_v59 }
  0xe0   : > { %423 = vmatmul.bf16.vlgmr.msra.gmra.mxu1 %v346_v60 }
 0x15d   : > { %v424_v62 = vpop.f32.mrf.mxu1 }
 0x15e   : > { %v425_v63 = vadd.f32 %v581_v61, %v424_v62 }
 0x160   : > { %428 = vst [vmem:[%s219_s15] sm:$0xff] %v425_v63 }
 0x165   : > { %v426_v0 = vpop.f32.mrf.mxu1 }
 0x166 PF: > { %s15_s18 = sadd.s32 1, %s590_s18  }
 0x167   : > { %p12_p4 = scmp.ge.s32.totalorder %s15_s18, 4  }
 0x169   :  { %14 = sbr.rel (!%p12_p4) target bundleno = 1 (0x1), region = 70 }

</bundles_post_ra>
